<compile_context>
chip_gen: v7x
topology: tpu7x:2x2x1
jax: 0.10.0
libtpu: 0.0.40
codegen_flags: <defaults>
</compile_context>

<pallas_src>
import numpy as np
import jax
import jax.numpy as jnp
from jax.experimental import pallas as pl
from jax.experimental.pallas import tpu as pltpu

# Below this size the ~1-2 us kernel launch overhead exceeds the copy time, so
# the "auto" policy skips the kernel entirely (the op is metadata-only anyway).
_SMALL_BYTES = 4 << 20          # 4 MiB
_TARGET_CHUNK_BYTES = 16 << 20  # per-DMA chunk; HBM->HBM, uses no VMEM
_MAX_CHUNKS = 64                # cap on the statically unrolled chunk loop
_MAX_INFLIGHT = 4               # outstanding DMAs


def _pallas_hbm_copy(x2d: jax.Array) -> jax.Array:
    """Bit-exact copy of a 2-D array via chunked HBM->HBM DMAs.

    Both refs stay in HBM (memory_space=pl.ANY): no VMEM round trip, no
    TensorCore vld/vst filler, no VMEM-capacity pressure on v5e/v6e/v7x.
    Up to _MAX_INFLIGHT copies are kept outstanding on a semaphore ring.
    """
    batch, feat = (int(s) for s in x2d.shape)
    n = batch * feat
    dtype = x2d.dtype
    itemsize = jnp.dtype(dtype).itemsize

    # Present the buffer as a wide, lane-dense slab (cols divides n exactly).
    cols = next(c for c in (2048, 1024, 512, 256, 128) if n % c == 0)
    rows = n // cols
    slab = jnp.reshape(x2d, (rows, cols))          # metadata only

    chunk_rows = max(1, _TARGET_CHUNK_BYTES // (cols * itemsize))
    chunk_rows = min(chunk_rows, rows)
    nchunks = -(-rows // chunk_rows)
    if nchunks > _MAX_CHUNKS:                      # keep the static unroll small
        chunk_rows = -(-rows // _MAX_CHUNKS)
        nchunks = -(-rows // chunk_rows)
    nbuf = max(1, min(_MAX_INFLIGHT, nchunks))

    def kernel(x_hbm, o_hbm, sems):
        copies = []
        for i in range(nchunks):                   # static Python unroll
            if nchunks == 1:
                src, dst = x_hbm, o_hbm
            else:
                lo = i * chunk_rows
                sz = min(chunk_rows, rows - lo)    # static; ragged tail is fine
                src = x_hbm.at[pl.ds(lo, sz)]
                dst = o_hbm.at[pl.ds(lo, sz)]
            cp = pltpu.make_async_copy(src, dst, sems.at[i % nbuf])
            if i >= nbuf:
                copies[i - nbuf].wait()            # free the sem slot we reuse
            cp.start()
            copies.append(cp)
        for cp in copies[max(0, nchunks - nbuf):]:
            cp.wait()

    out = pl.pallas_call(
        kernel,
        out_shape=jax.ShapeDtypeStruct((rows, cols), dtype),
        in_specs=[pl.BlockSpec(memory_space=pl.ANY)],
        out_specs=pl.BlockSpec(memory_space=pl.ANY),
        scratch_shapes=[pltpu.SemaphoreType.DMA((nbuf,))],
    )(slab)

    return jnp.reshape(out, (batch, feat))         # metadata only


class BatchFlatten:
    """JAX/Pallas equivalent of the PyTorch BatchFlatten(nn.Module).

    materialize:
      "never"  -- pure metadata reshape (exact torch .view semantics, 0 bytes moved)
      "auto"   -- metadata reshape unless the buffer is >= 4 MiB (default)
      "always" -- always run the Pallas HBM->HBM copy (used by the self-test)
    """

    def __init__(self, materialize: str = "auto"):
        self._name = "batch_flatten"
        self._materialize = materialize

    def __call__(self, x: jax.Array) -> jax.Array:
        batch = int(x.shape[0])
        feat = int(np.prod(x.shape[1:])) if x.ndim > 1 else 1
        out = jnp.reshape(x, (batch, feat))        # metadata only (row-major)

        if self._materialize == "never":
            return out
        n = batch * feat
        if n == 0:
            return out
        if (self._materialize == "auto"
                and n * jnp.dtype(x.dtype).itemsize < _SMALL_BYTES):
            return out                             # copy would be pure overhead
        if n % 128 != 0:
            # TODO(synk): ragged element counts (n % 128 != 0) keep the
            # metadata-only reshape; the DMA path wants a lane-dense slab.
            return out
        return _pallas_hbm_copy(out)


if __name__ == "__main__":
    key = jax.random.PRNGKey(0)
    # Small NCHW example: batch=2, channels=4, 16x16 spatial.
    x = jax.random.normal(key, (2, 4, 16, 16), dtype=jnp.float32)

    ref = jnp.reshape(x, (2, -1))  # torch .view(B, -1) on contiguous data

    # Default policy: small input -> metadata-only reshape, no kernel launch.
    y_auto = jax.block_until_ready(BatchFlatten()(x))
    np.testing.assert_array_equal(np.asarray(y_auto), np.asarray(ref))

    # Force the Pallas HBM->HBM DMA path so the kernel actually executes.
    y = jax.block_until_ready(BatchFlatten(materialize="always")(x))
    assert y.shape == (2, 4 * 16 * 16), y.shape
    assert y.dtype == x.dtype
    np.testing.assert_array_equal(np.asarray(y), np.asarray(ref))

    print("KERNEL_OK")
</pallas_src>

<mosaic_0001>
module attributes {stable_mosaic.version = 11 : i64} {
  func.func @kernel(%arg0: memref<1x2048xf32, #tpu.memory_space<any>>, %arg1: memref<1x2048xf32, #tpu.memory_space<any>>, %arg2: memref<1x!tpu.dma_semaphore, #tpu.memory_space<semaphore_mem>>) attributes {dimension_semantics = [], scalar_prefetch = 0 : i64, scratch_operands = 1 : i64, tpu.core_type = #tpu.core_type<tc>} {
    %c0_i32 = arith.constant 0 : i32
    %0 = tpu.memref_slice %arg2[%c0_i32] : memref<1x!tpu.dma_semaphore, #tpu.memory_space<semaphore_mem>> -> memref<1x!tpu.dma_semaphore, #tpu.memory_space<semaphore_mem>>
    %1 = tpu.memref_squeeze %0 : memref<1x!tpu.dma_semaphore, #tpu.memory_space<semaphore_mem>> -> memref<!tpu.dma_semaphore, #tpu.memory_space<semaphore_mem>>
    tpu.enqueue_dma source(%arg0 : memref<1x2048xf32, #tpu.memory_space<any>>) target(%arg1 : memref<1x2048xf32, #tpu.memory_space<any>>) target_semaphore(%1 : memref<!tpu.dma_semaphore, #tpu.memory_space<semaphore_mem>>)
    %c0_i32_0 = arith.constant 0 : i32
    %2 = tpu.memref_slice %arg2[%c0_i32_0] : memref<1x!tpu.dma_semaphore, #tpu.memory_space<semaphore_mem>> -> memref<1x!tpu.dma_semaphore, #tpu.memory_space<semaphore_mem>>
    %3 = tpu.memref_squeeze %2 : memref<1x!tpu.dma_semaphore, #tpu.memory_space<semaphore_mem>> -> memref<!tpu.dma_semaphore, #tpu.memory_space<semaphore_mem>>
    tpu.wait_dma2 semaphore(%3 : memref<!tpu.dma_semaphore, #tpu.memory_space<semaphore_mem>>) src(%arg0 : memref<1x2048xf32, #tpu.memory_space<any>>) dst(%arg1 : memref<1x2048xf32, #tpu.memory_space<any>>)
    return
  }
}

</mosaic_0001>

<bundles_post_ra>
// kernel: tpu_custom_call.1
= control target key start
LH: loop header
LB: loop body
LE: loop exit
PB: predicated region body
PF: predicated region fallthrough
CT: control target
= control target key end

     0   :  { %s34_s6 = smov [#allocation2]   ;;  %s35_s7 = smov [#allocation3]   ;;  %s53_s0 = inlined_call_operand.hbm [shape: f32[1,2048], index: 0, kind: input, shape index: {}]   ;;  %s54_s1 = inlined_call_operand.hbm [shape: f32[1,2048], index: 1, kind: output, shape index: {}]  }
   0x1   :  { %s36_s8 = smov 0  }
   0x2   :  { %18 = dma.general %s53_s0, 256, %s54_s1, %s34_s6, %s35_s7, [#allocation4], %s36_s8, 0  }
   0x3   :  { %32 = dma.done.wait [#allocation2], 256 }
   0x4   :  { %33 = vsyncadd [#allocation2], 4294967040 }
   0x5   :  { %22 = vsyncmov [#allocation2] }
   0x8   :  { %s23_s13 = vpop.sfrf %22 }
   0x9   :  { %p28_p0 = scmp.ne.s32.totalorder %s23_s13, 0 }
   0xb   :  { %27 = shalt.err (%p28_p0)  }

</bundles_post_ra>
